<compile_context>
chip_gen: v5e
topology: v5e:2x2
jax: 0.10.0
libtpu: 0.0.40
codegen_flags: <defaults>
</compile_context>

<pallas_src>
import numpy as np
import jax
import jax.numpy as jnp
from jax.experimental import pallas as pl
from jax.experimental.pallas import tpu as pltpu


def ffn_kernel(x_ref, w1_ref, b1_ref, w2_ref, b2_ref, o_ref, acc_ref):
    # x_ref:  (tm, in_size)
    # w1_ref: (in_size, tk)     hid-chunk of fc_1 weight (pre-transposed)
    # b1_ref: (1, tk)
    # w2_ref: (tk, out_pad)     hid-chunk of fc_2 weight (pre-transposed)
    # b2_ref: (1, out_pad)
    # o_ref:  (tm, out_pad)
    # acc_ref:(tm, out_pad) f32 scratch accumulator (persists across k)
    k = pl.program_id(1)

    @pl.when(k == 0)
    def _():
        acc_ref[...] = jnp.zeros_like(acc_ref)

    # ---- fc_1 chunk + bias + ReLU (ReLU is elementwise over hid, so chunking
    #      the hidden dimension is exact) ----
    h = jnp.dot(x_ref[...], w1_ref[...], preferred_element_type=jnp.float32)
    h = jnp.maximum(h + b1_ref[...], 0.0)

    # ---- Dropout: identity in eval mode ----
    # TODO(synk): stochastic training-mode dropout not implemented.

    # ---- fc_2 chunk, accumulated in f32 ----
    acc_ref[...] += jnp.dot(h.astype(w2_ref.dtype), w2_ref[...],
                            preferred_element_type=jnp.float32)

    @pl.when(k == pl.num_programs(1) - 1)
    def _():
        o_ref[...] = (acc_ref[...] + b2_ref[...]).astype(o_ref.dtype)


def positionwise_ffn(x, w1, b1, w2, b2, *, max_tile_m=512, max_tile_k=512,
                     compute_dtype=None):
    """Fused FFN forward (eval-mode semantics).

    x:  (..., in_size)
    w1: (hid_size, in_size), b1: (hid_size,)   -- PyTorch nn.Linear layout
    w2: (out_size, hid_size), b2: (out_size,)
    returns: (..., out_size)
    """
    in_size = x.shape[-1]
    hid_size = w1.shape[0]
    out_size = w2.shape[0]

    lead_shape = x.shape[:-1]
    M = int(np.prod(lead_shape)) if lead_shape else 1
    x2 = x.reshape(M, in_size)

    # ---- host-side layout prep ----
    w1t = jnp.asarray(w1).T                      # (in_size, hid_size)
    w2t = jnp.asarray(w2).T                      # (hid_size, out_size)
    b1r = jnp.asarray(b1).reshape(1, hid_size).astype(jnp.float32)
    b2r = jnp.asarray(b2).reshape(1, out_size).astype(jnp.float32)

    if compute_dtype is not None:                # optional bf16 fast path
        x2 = x2.astype(compute_dtype)
        w1t = w1t.astype(compute_dtype)
        w2t = w2t.astype(compute_dtype)

    # Lane-dense output: pad out dim to a multiple of 128.
    out_pad = ((out_size + 127) // 128) * 128

    # Hidden-dim chunking so weight tiles + intermediate stay small in VMEM.
    if hid_size <= 1024:
        tk = hid_size
        hid_pad = hid_size
    else:
        tk = max_tile_k                          # multiple of 128
        hid_pad = ((hid_size + tk - 1) // tk) * tk

    if hid_pad != hid_size:
        w1t = jnp.pad(w1t, ((0, 0), (0, hid_pad - hid_size)))
        b1r = jnp.pad(b1r, ((0, 0), (0, hid_pad - hid_size)))
        w2t = jnp.pad(w2t, ((0, hid_pad - hid_size), (0, 0)))
    if out_pad != out_size:
        w2t = jnp.pad(w2t, ((0, 0), (0, out_pad - out_size)))
        b2r = jnp.pad(b2r, ((0, 0), (0, out_pad - out_size)))

    x_item = np.dtype(x2.dtype).itemsize
    w_item = np.dtype(w1t.dtype).itemsize
    o_item = np.dtype(x.dtype).itemsize

    # ---- row-tile (M) selection: prefer >=2 parallel tiles (v7x megacore),
    #      cap by a VMEM budget ----
    m_al = ((M + 7) // 8) * 8
    if m_al <= 8:
        tm = m_al
    else:
        tm = min(max_tile_m, ((m_al // 2 + 7) // 8) * 8)

    budget = 48 * 1024 * 1024                    # target block footprint
    weight_bytes = 2 * ((in_size * tk + tk * out_pad) * w_item
                        + (tk + out_pad) * 4)    # double-buffered weight/bias
    per_row = 2 * (in_size * x_item + out_pad * o_item) + out_pad * 4
    avail = max(budget - weight_bytes, per_row * 8)
    tm_cap = max(8, (avail // per_row) // 8 * 8)
    tm = int(min(tm, tm_cap))

    m_pad = ((M + tm - 1) // tm) * tm
    if m_pad != M:
        x2 = jnp.pad(x2, ((0, m_pad - M), (0, 0)))

    grid = (m_pad // tm, hid_pad // tk)

    # Explicit VMEM budget: >= 32 MiB (default on v6e), <= 64 MiB (fits v7x).
    needed = weight_bytes + tm * per_row + (4 << 20)
    vmem_limit = int(min(64 << 20, max(32 << 20, needed)))

    flops = 2 * M * (in_size * hid_size + hid_size * out_size)
    bytes_accessed = (M * in_size * x_item
                      + (in_size * hid_size + hid_size * out_size) * w_item
                      + (hid_size + out_size) * 4
                      + M * out_size * o_item)
    cost = pl.CostEstimate(flops=flops, transcendentals=0,
                           bytes_accessed=int(bytes_accessed))

    out = pl.pallas_call(
        ffn_kernel,
        out_shape=jax.ShapeDtypeStruct((m_pad, out_pad), x.dtype),
        grid=grid,
        in_specs=[
            pl.BlockSpec((tm, in_size), lambda i, k: (i, 0)),     # x rows
            pl.BlockSpec((in_size, tk), lambda i, k: (0, k)),     # w1^T chunk
            pl.BlockSpec((1, tk), lambda i, k: (0, k)),           # b1 chunk
            pl.BlockSpec((tk, out_pad), lambda i, k: (k, 0)),     # w2^T chunk
            pl.BlockSpec((1, out_pad), lambda i, k: (0, 0)),      # b2
        ],
        out_specs=pl.BlockSpec((tm, out_pad), lambda i, k: (i, 0)),
        scratch_shapes=[pltpu.VMEM((tm, out_pad), jnp.float32)],
        compiler_params=pltpu.CompilerParams(
            dimension_semantics=("parallel", "arbitrary"),
            vmem_limit_bytes=vmem_limit),
        cost_estimate=cost,
    )(x2, w1t, b1r, w2t, b2r)

    out = out[:M, :out_size]
    return out.reshape(lead_shape + (out_size,))


def reference(x, w1, b1, w2, b2):
    """Pure-JAX reference (eval-mode semantics): fc_2(relu(fc_1(x)))."""
    h = jnp.maximum(x @ w1.T + b1, 0.0)
    return h @ w2.T + b2


if __name__ == "__main__":
    # Small shapes consistent with the module: batch=2, seq=8,
    # in_size=16, hid_size=32, out_size=16, p=0.1 (Dropout, identity in eval).
    N, S, IN, HID, OUT = 2, 8, 16, 32, 16

    key = jax.random.PRNGKey(0)
    keys = jax.random.split(key, 5)
    x = jax.random.normal(keys[0], (N, S, IN), jnp.float32)

    w1 = jax.random.normal(keys[1], (HID, IN), jnp.float32) * 0.1
    b1 = jax.random.normal(keys[2], (HID,), jnp.float32) * 0.1
    w2 = jax.random.normal(keys[3], (OUT, HID), jnp.float32) * 0.1
    b2 = jax.random.normal(keys[4], (OUT,), jnp.float32) * 0.1

    out = positionwise_ffn(x, w1, b1, w2, b2)
    out = jax.block_until_ready(out)

    ref = jax.block_until_ready(reference(x, w1, b1, w2, b2))
    assert out.shape == (N, S, OUT)
    np.testing.assert_allclose(np.asarray(out), np.asarray(ref),
                               rtol=1e-4, atol=1e-4)
    print("KERNEL_OK")
</pallas_src>

<mosaic_0001>
module attributes {stable_mosaic.version = 11 : i64} {
  func.func @ffn_kernel(%arg0: i32, %arg1: i32, %arg2: memref<8x16xf32, #tpu.memory_space<vmem>>, %arg3: memref<16x32xf32, #tpu.memory_space<vmem>>, %arg4: memref<1x32xf32, #tpu.memory_space<vmem>>, %arg5: memref<32x128xf32, #tpu.memory_space<vmem>>, %arg6: memref<1x128xf32, #tpu.memory_space<vmem>>, %arg7: memref<8x128xf32, #tpu.memory_space<vmem>>, %arg8: memref<8x128xf32, #tpu.memory_space<vmem>>) attributes {dimension_semantics = [#tpu.dimension_semantics<parallel>, #tpu.dimension_semantics<arbitrary>], iteration_bounds = array<i64: 2, 1>, scalar_prefetch = 0 : i64, scratch_operands = 1 : i64, tpu.core_type = #tpu.core_type<tc>, window_params = [{transform_indices = @transform_0, window_bounds = array<i64: 8, 16>}, {transform_indices = @transform_1, window_bounds = array<i64: 16, 32>}, {transform_indices = @transform_2, window_bounds = array<i64: 1, 32>}, {transform_indices = @transform_3, window_bounds = array<i64: 32, 128>}, {pipeline_mode = #tpu.pipeline_mode<synchronous>, transform_indices = @transform_4, window_bounds = array<i64: 1, 128>}, {transform_indices = @transform_5, window_bounds = array<i64: 8, 128>}]} {
    %c0_i32 = arith.constant 0 : i32
    %0 = arith.cmpi eq, %arg1, %c0_i32 : i32
    %1 = arith.extui %0 : i1 to i32
    %c0_i32_0 = arith.constant 0 : i32
    %2 = arith.cmpi ne, %1, %c0_i32_0 : i32
    scf.if %2 {
      %cst_16 = arith.constant 0.000000e+00 : f32
      %19 = vector.broadcast %cst_16 : f32 to vector<8x128xf32>
      %c0_17 = arith.constant 0 : index
      %c0_18 = arith.constant 0 : index
      %20 = vector.load %arg8[%c0_17, %c0_18] : memref<8x128xf32, #tpu.memory_space<vmem>>, vector<8x128xf32>
      tpu.vector_store %arg8[%c0_17, %c0_18], %19 {strides = array<i32>} : memref<8x128xf32, #tpu.memory_space<vmem>>, vector<8x128xf32>,
    } else {
    }
    %c0 = arith.constant 0 : index
    %c0_1 = arith.constant 0 : index
    %3 = vector.load %arg2[%c0, %c0_1] : memref<8x16xf32, #tpu.memory_space<vmem>>, vector<8x16xf32>
    %c0_2 = arith.constant 0 : index
    %c0_3 = arith.constant 0 : index
    %4 = vector.load %arg3[%c0_2, %c0_3] : memref<16x32xf32, #tpu.memory_space<vmem>>, vector<16x32xf32>
    %cst = arith.constant dense<0.000000e+00> : vector<8x32xf32>
    %5 = tpu.matmul %3, %4, %cst {dimension_numbers = #tpu.dot_dimension_numbers<[1], [0], [0], [1], [0, 0, 1, 1], [], []>} : vector<8x16xf32>, vector<16x32xf32>, vector<8x32xf32> -> vector<8x32xf32>
    %c0_4 = arith.constant 0 : index
    %c0_5 = arith.constant 0 : index
    %6 = vector.load %arg4[%c0_4, %c0_5] : memref<1x32xf32, #tpu.memory_space<vmem>>, vector<1x32xf32>
    %7 = vector.broadcast %6 : vector<1x32xf32> to vector<8x32xf32>
    %8 = arith.addf %5, %7 : vector<8x32xf32>
    %cst_6 = arith.constant 0.000000e+00 : f32
    %9 = vector.broadcast %cst_6 : f32 to vector<8x32xf32>
    %10 = arith.maximumf %8, %9 : vector<8x32xf32>
    %c0_7 = arith.constant 0 : index
    %c0_8 = arith.constant 0 : index
    %11 = vector.load %arg8[%c0_7, %c0_8] : memref<8x128xf32, #tpu.memory_space<vmem>>, vector<8x128xf32>
    %c0_9 = arith.constant 0 : index
    %c0_10 = arith.constant 0 : index
    %12 = vector.load %arg5[%c0_9, %c0_10] : memref<32x128xf32, #tpu.memory_space<vmem>>, vector<32x128xf32>
    %cst_11 = arith.constant dense<0.000000e+00> : vector<8x128xf32>
    %13 = tpu.matmul %10, %12, %cst_11 {dimension_numbers = #tpu.dot_dimension_numbers<[1], [0], [0], [1], [0, 0, 1, 1], [], []>} : vector<8x32xf32>, vector<32x128xf32>, vector<8x128xf32> -> vector<8x128xf32>
    %14 = arith.addf %11, %13 : vector<8x128xf32>
    %c0_12 = arith.constant 0 : index
    %c0_13 = arith.constant 0 : index
    %15 = vector.load %arg8[%c0_12, %c0_13] : memref<8x128xf32, #tpu.memory_space<vmem>>, vector<8x128xf32>
    tpu.vector_store %arg8[%c0_12, %c0_13], %14 {strides = array<i32>} : memref<8x128xf32, #tpu.memory_space<vmem>>, vector<8x128xf32>,
    %c0_i32_14 = arith.constant 0 : i32
    %16 = arith.cmpi eq, %arg1, %c0_i32_14 : i32
    %17 = arith.extui %16 : i1 to i32
    %c0_i32_15 = arith.constant 0 : i32
    %18 = arith.cmpi ne, %17, %c0_i32_15 : i32
    scf.if %18 {
      %c0_16 = arith.constant 0 : index
      %c0_17 = arith.constant 0 : index
      %19 = vector.load %arg8[%c0_16, %c0_17] : memref<8x128xf32, #tpu.memory_space<vmem>>, vector<8x128xf32>
      %c0_18 = arith.constant 0 : index
      %c0_19 = arith.constant 0 : index
      %20 = vector.load %arg6[%c0_18, %c0_19] : memref<1x128xf32, #tpu.memory_space<vmem>>, vector<1x128xf32>
      %21 = vector.broadcast %20 : vector<1x128xf32> to vector<8x128xf32>
      %22 = arith.addf %19, %21 : vector<8x128xf32>
      %c0_20 = arith.constant 0 : index
      %c0_21 = arith.constant 0 : index
      %23 = vector.load %arg7[%c0_20, %c0_21] : memref<8x128xf32, #tpu.memory_space<vmem>>, vector<8x128xf32>
      tpu.vector_store %arg7[%c0_20, %c0_21], %22 {strides = array<i32>} : memref<8x128xf32, #tpu.memory_space<vmem>>, vector<8x128xf32>,
    } else {
    }
    return
  }
  func.func @transform_0(%arg0: i32, %arg1: i32) -> (i32, i32) {
    %c0_i32 = arith.constant 0 : i32
    %c0_i32_0 = arith.constant 0 : i32
    return %arg0, %c0_i32 : i32, i32
  }
  func.func @transform_1(%arg0: i32, %arg1: i32) -> (i32, i32) {
    %c0_i32 = arith.constant 0 : i32
    %c0_i32_0 = arith.constant 0 : i32
    return %c0_i32, %arg1 : i32, i32
  }
  func.func @transform_2(%arg0: i32, %arg1: i32) -> (i32, i32) {
    %c0_i32 = arith.constant 0 : i32
    %c0_i32_0 = arith.constant 0 : i32
    return %c0_i32, %arg1 : i32, i32
  }
  func.func @transform_3(%arg0: i32, %arg1: i32) -> (i32, i32) {
    %c0_i32 = arith.constant 0 : i32
    %c0_i32_0 = arith.constant 0 : i32
    return %arg1, %c0_i32 : i32, i32
  }
  func.func @transform_4(%arg0: i32, %arg1: i32) -> (i32, i32) {
    %c0_i32 = arith.constant 0 : i32
    %c0_i32_0 = arith.constant 0 : i32
    %c0_i32_1 = arith.constant 0 : i32
    return %c0_i32, %c0_i32_0 : i32, i32
  }
  func.func @transform_5(%arg0: i32, %arg1: i32) -> (i32, i32) {
    %c0_i32 = arith.constant 0 : i32
    %c0_i32_0 = arith.constant 0 : i32
    return %arg0, %c0_i32 : i32, i32
  }
}

</mosaic_0001>

<bundles_post_ra>
// kernel: tpu_custom_call.1
= control target key start
LH: loop header
LB: loop body
LE: loop exit
PB: predicated region body
PF: predicated region fallthrough
CT: control target
= control target key end

     0   :  { %10 = vsyncpa [#allocation4], 0  ;;  %s997_s0 = inlined_call_operand.hbm [shape: f32[16,16], index: 0, kind: input, shape index: {}]   ;;  %s998_s1 = inlined_call_operand.hbm [shape: f32[16,32], index: 1, kind: input, shape index: {}]   ;;  %s999_s2 = inlined_call_operand.vmem [shape: f32[1,32], index: 2, kind: input, shape index: {}]   ;;  %s1000_s3 = inlined_call_operand.hbm [shape: f32[32,128], index: 3, kind: input, shape index: {}]   ;;  %s1001_s4 = inlined_call_operand.vmem [shape: f32[1,128], index: 4, kind: input, shape index: {}]   ;;  %s1002_s5 = inlined_call_operand.hbm [shape: f32[16,128], index: 5, kind: output, shape index: {}]  }
   0x1   :  { %12 = vsyncpa [#allocation4 + $0x1], 0 }
   0x2   :  { %13 = vsyncpa [#allocation7], 0 }
   0x3   :  { %14 = vsyncpa [#allocation5], 0 }
   0x4   :  { %16 = vsyncpa [#allocation5 + $0x1], 0  ;;  %s843_s18 = smov 0   ;;  %s845_s19 = smov 0  }
   0x5   :  { %s847_s20 = smov 0   ;;  %s849_s21 = smov 0  }
   0x6   :  { %s851_s22 = smov 0   ;;  %s853_s23 = smov 0  }
   0x7 LB: > { %s524_s24 = sadd.s32 4294967295, %s807_s23   ;;  %p526_p0 = scmp.ge.s32.totalorder %s807_s23, 1  ;;  %s807_s23 = sphi %s853_s23, %s22_s23   ;;  %s803_s22 = sphi %s851_s22, %s1012_s22   ;;  %s799_s21 = sphi %s849_s21, %s1011_s21   ;;  %s795_s20 = sphi %s847_s20, %s1010_s20   ;;  %s791_s19 = sphi %s845_s19, %s1009_s19   ;;  %s787_s18 = sphi %s843_s18, %s1008_s18  }
   0x8   : > { %p877_p1 = scmp.eq.s32.totalorder %s524_s24, 0  ;;  %p190_p2 = scmp.lt.s32.totalorder %s807_s23, 3 }
   0x9   : > { %s203_s28 = sshll.u32 %s998_s1, 4  ;;  %s809_s30 = smov [#allocation6]   ;;  %s204_s28 = int_to_ptr.hbm [resolvable:$true] %s203_s28 }
   0xa   : > { %p885_p3 = pnand %p526_p0, %p190_p2  ;;  %s205_s6 = sshll.u32 %s809_s30, 4  ;;  %s206_s6 = int_to_ptr.vmem [resolvable:$true] %s205_s6 }
   0xb   : > { %p530_p6 = scmp.ge.s32.totalorder %s807_s23, 2  ;;  %s226_s9 = sshll.u32 %s1000_s3, 4  ;;  %s227_s9 = int_to_ptr.hbm [resolvable:$true] %s226_s9 }
   0xc   : > { %p556_p4 = pneg %p885_p3  ;;  %s810_s10 = smov 128  }
   0xd   : > { %s811_s11 = smov 8   ;;  %s812_s12 = smov [#allocation8]  }
   0xe   : > { %p557_p5 = pnand %p556_p4, %p877_p1  ;;  %s228_s13 = sshll.u32 %s812_s12, 4  ;;  %s229_s13 = int_to_ptr.vmem [resolvable:$true] %s228_s13 }
   0xf   : > { %s34_s14 = sadd.s32 1, %s803_s22  ;;  %s525_s15 = sadd.s32 4294967294, %s807_s23  }
  0x10   : > { %559 = dma.hbm_to_vmem [thread:$0]  (!%p557_p5), %s204_s28, 256, %s206_s6, [#allocation7], %s810_s10, %s810_s10, %s811_s11  }
  0x11   : > { %562 = dma.hbm_to_vmem [thread:$0]  (!%p557_p5), %s227_s9, 512, %s229_s13, [#allocation7], %s810_s10, %s810_s10, %s811_s11  }
  0x12   : > { %p36_p7 = scmp.ge.s32.totalorder %s34_s14, 2  ;;  %s41_s16 = sadd.s32 1, %s795_s20 }
  0x13   : > { %p48_p8 = scmp.ne.s32.totalorder %s795_s20, %s791_s19  ;;  %p49_p9 = scmp.eq.s32.totalorder %s807_s23, 0 }
  0x14   : > { %s1014_s14 = smov (%p36_p7, %s34_s14), 0  ;;  %p54_p10 = scmp.ne.s32.totalorder %s791_s19, %s787_s18 }
  0x15   : > { %s38_s17 = ssub.s32 %s803_s22, %s1014_s14  ;;  %p177_p11 = scmp.eq.s32.totalorder %s524_s24, 1 }
  0x16   : > { %p39_p12 = scmp.eq.s32.totalorder %s38_s17, 0  ;;  %p913_p13 = por %p877_p1, %p54_p10 }
  0x17   : > { %p917_p0 = por %p177_p11, %p48_p8  ;;  %p183_p2 = scmp.eq.s32.totalorder %s525_s15, 1 }
  0x18   : > { %s922_s28 = scalar_select %p39_p12, %s795_s20, %s41_s16  }
  0x19   : > { %p50_p4 = por %p49_p9, %p48_p8  ;;  %p924_p5 = por %p183_p2, %p54_p10 }
  0x1a   : > { %s245_s6 = sand.u32 1, %s795_s20   ;;  %s532_s24 = sshll.u32 %s803_s22, 3 }
  0x1b   : > { %p573_p7 = scmp.lt.s32.totalorder %s807_s23, 2  ;;  %s531_s7 = sshll.u32 %s245_s6, 3 }
  0x1c   : > { %s253_s10 = scalar_lea.hbm %s997_s0, %s532_s24  ;;  %s249_s12 = scalar_lea.vmem [#allocation3], %s531_s7 }
  0x1d   : > { %s255_s11 = sshll.u32 %s253_s10, 4  ;;  %s257_s13 = sshll.u32 %s249_s12, 4  ;;  %s256_s11 = int_to_ptr.hbm [resolvable:$true] %s255_s11  ;;  %s258_s13 = int_to_ptr.vmem [resolvable:$true] %s257_s13 }
  0x1e   : > { %p564_p11 = pnand %p573_p7, %p50_p4  ;;  %s246_s15 = scalar_lea.sflag [#allocation4], %s245_s6 }
  0x1f   : > { %266 = sbr.rel (%p885_p3) target bundleno = 304 (0x130), region = 40  ;;  %s937_s16 = sand.u32 (!%p885_p3), 1, %s791_s19  }
  0x20   : > { %566 = dma.hbm_to_vmem [thread:$0]  (!%p564_p11), %s256_s11, 128, %s258_s13, %s246_s15  }
  0x21   : > { %s534_s17 = sshll.u32 (!%p885_p3), %s937_s16, 3  ;;  %s269_s24 = scalar_lea.sflag (!%p885_p3), [#allocation4], %s937_s16 }
  0x22   : > { %s272_s7 = scalar_lea.vmem (!%p885_p3), [#allocation3], %s534_s17 }
  0x24   : > { %774 = dma.done.wait (%p913_p13), %s269_s24, 128  }
  0x25   : > { %776 = vsyncadd (%p913_p13), %s269_s24, 4294967168 }
  0x26   : > { %778 = dma.done.wait (%p877_p1), [#allocation7], 768  }
  0x27   : > { %780 = vsyncadd (%p877_p1), [#allocation7], 4294966528  ;;  %v324_v0 = vld [vmem:[#allocation6 + $0x8] sm:$0xff]  ;;  %v323_v1 = vld [vmem:[#allocation6] sm:$0xff]  ;;  %vm329_vm0 = vcmask 130048   ;;  %vm359_vm1 = vcmask 261120  }
  0x28   : > { %347 = vmatpush.msra.mxu0 %v324_v0  ;;  %v322_v2 = vld [vmem:[%s272_s7] sm:$0xff]  ;;  %v358_v3 = vld [vmem:[#allocation8 + $0x18] sm:$0xff]  ;;  %v357_v4 = vld [vmem:[#allocation8 + $0x10] sm:$0xff]  ;;  %s541_s26 = sshll.u32 %s799_s21, 3  ;;  %s312_s12 = scalar_lea.vmem [#allocation9], %s534_s17 }
  0x29   : > { %375 = vmatpush.msra.mxu1 %v358_v3  ;;  %v356_v5 = vld [vmem:[#allocation8 + $0x8] sm:$0xff]  ;;  %v355_v6 = vld [vmem:[#allocation8] sm:$0xff]  ;;  %s406_s9 = scalar_lea.hbm %s1002_s5, %s541_s26  ;;  %s408_s13 = sshll.u32 %s312_s12, 4  ;;  %s409_s13 = int_to_ptr.vmem [resolvable:$true] %s408_s13 }
  0x2a   : > { %348 = vmatpush.msra.mxu0 %v323_v1  ;;  %v629_v7 = vld [vmem:[%s999_s2] ss:$0 sm:$0xff]  ;;  %s410_s15 = sshll.u32 %s406_s9, 4  ;;  %s396_s24 = scalar_lea.sflag [#allocation5], %s937_s16  ;;  %s411_s15 = int_to_ptr.hbm [resolvable:$true] %s410_s15 }
  0x2b   : > { %538 = vmatmul.msk.f32.vlgmr.msra.gmra.mxu0 %vm329_vm0, %v322_v2  ;;  %376 = vmatpush.msra.mxu1 %v357_v4  ;;  %v630_v11 = vld [vmem:[%s1001_s4] ss:$0 sm:$0xff]  ;;  %s735_s21 = sshra.s32 %s411_s15, 4  ;;  %s741_s26 = scalar_lea.hbm %s1002_s5, 16  ;;  %s736_s21 = int_to_ptr.hbm [resolvable:$true] %s735_s21 }
  0x2c   : > { %s737_s7 = scalar_lea.hbm %s736_s21, 8  ;;  %p742_p9 = scmp.lt.s32.totalorder %s736_s21, %s1002_s5 }
  0x2d   : > { %377 = vmatpush.msra.mxu1 %v356_v5  ;;  %p738_p1 = scmp.ne.s32.totalorder %s736_s21, %s737_s7  ;;  %p743_p10 = scmp.lt.s32.totalorder %s741_s26, %s737_s7 }
  0x2f   : > { %378 = vmatpush.msra.mxu1 %v355_v6  ;;  %p739_p3 = pnand %p738_p1, %p917_p0  ;;  %p744_p12 = por %p743_p10, %p742_p9 }
  0x31   : > { %p740_p8 = pneg %p739_p3 }
  0x33   : > { %p745_p13 = pnand %p744_p12, %p740_p8 }
  0xa8   : > { %v350_v8 = vpop.f32.mrf.mxu0 }
  0xa9   : > { %v351_v9 = vadd.f32 %v629_v7, %v350_v8 }
  0xab   : > { %v353_v10 = vmax.f32 %v351_v9, 0.0 }
  0xad   : > { %539 = vmatmul.msk.f32.vlgmr.msra.gmra.mxu1 %vm359_vm1, %v353_v10 }
 0x12a   : > { %v380_v12 = vpop.f32.mrf.mxu1 }
 0x12b   : > { %v393_v13 = vadd.f32 %v630_v11, %v380_v12 }
 0x12d   : > { %394 = vst [vmem:[%s312_s12] sm:$0xff] %v393_v13 }
 0x12e   : > { %748 = shalt.err (!%p745_p13)
}
 0x12f   : > { %554 = dma.vmem_to_hbm [thread:$0]  (%p917_p0), %s409_s13, 128, %s411_s15, %s396_s24  }
 0x130 PF: > { %s422_s16 = sand.u32 1, %s787_s18   ;;  %p568_p2 = pnand %p530_p6, %p924_p5 }
 0x131   : > { %s423_s8 = scalar_lea.sflag [#allocation5], %s422_s16 }
 0x132   : > { %p569_p4 = pneg %p568_p2 }
 0x134   : > { %782 = dma.done.wait (%p569_p4), %s423_s8, 128  }
 0x135   : > { %784 = vsyncadd (%p569_p4), %s423_s8, 4294967168  ;;  %s22_s23 = sadd.s32 1, %s807_s23   ;;  %s1008_s18 = smov %s791_s19 }
 0x136   : > { %p19_p7 = scmp.ge.s32.totalorder %s22_s23, 4   ;;  %s1009_s19 = smov %s795_s20 }
 0x137   : > { %s1010_s20 = smov %s922_s28  ;;  %s1011_s21 = smov %s803_s22 }
 0x138   : > { %s1012_s22 = smov %s1014_s14  ;;  %21 = sbr.rel (!%p19_p7) target bundleno = 7 (0x7), region = 106 }
 0x13d   :  { %429 = vsyncpa [#allocation4], 1 }
 0x13e   :  { %431 = vsyncpa [#allocation4 + $0x1], 1 }
 0x13f   :  { %432 = vsyncpa [#allocation7], 1 }
 0x140   :  { %433 = vsyncpa [#allocation5], 1 }
 0x141   :  { %435 = vsyncpa [#allocation5 + $0x1], 1 }

</bundles_post_ra>
